<compile_context>
chip_gen: v7x
topology: tpu7x:2x2x1
jax: 0.10.0
libtpu: 0.0.40
codegen_flags: <defaults>
</compile_context>

<pallas_src>
import jax
import jax.numpy as jnp
from jax import lax
from jax.experimental import pallas as pl
from jax.experimental.pallas import tpu as pltpu


def _inner_product_decoder_kernel(z0_ref, z1_ref, adj_ref):
    # Batch dim squeezed by the BlockSpec; refs are 2-D VMEM tiles:
    #   z0_ref: (TM, D), z1_ref: (TN_or_N, D), adj_ref: (TM, TN_or_N)
    # Contract the last dims of both operands so the transpose folds directly
    # into the MXU matmul; accumulate in f32.
    scores = lax.dot_general(
        z0_ref[...],
        z1_ref[...],
        dimension_numbers=(((1,), (1,)), ((), ())),
        preferred_element_type=jnp.float32,
    )
    # Exact, overflow-safe sigmoid: sigmoid(x) = 0.5 * tanh(0.5 * x) + 0.5.
    # One EUP push per vreg (vs exp + reciprocal), keeps EUP off the critical
    # path on v7x where the store stream is fast.
    adj = 0.5 * jnp.tanh(0.5 * scores) + 0.5
    adj_ref[...] = adj.astype(adj_ref.dtype)


def _round_up(x, m):
    return ((x + m - 1) // m) * m


# Budget for the resident-z1 row-slab regime; + headroom stays <= 32 MiB which
# is within the scoped VMEM default on every generation (incl. v7x).
_SLAB_VMEM_BUDGET = 24 * 1024 * 1024


def inner_product_decoder(z_0, z_1, *, out_dtype=None):
    """z_0, z_1: (B, N, D). Returns sigmoid(z_0 @ z_1^T) with shape (B, 1, N, N)."""
    B, N, D = z_0.shape
    assert z_1.shape == (B, N, D)
    if out_dtype is None:
        # Matches the PyTorch forward (same dtype as inputs). Pass
        # jnp.bfloat16 to halve output HBM bytes on this write-bound kernel.
        out_dtype = z_0.dtype

    in_b = jnp.dtype(z_0.dtype).itemsize
    out_b = jnp.dtype(out_dtype).itemsize
    d_lanes = _round_up(D, 128)   # VMEM lane padding of the contraction dim
    n_lanes = _round_up(N, 128)
    n_sub = _round_up(N, 8)

    # ---- Regime A: z_1 fully resident per batch + wide (tm, N) output slab.
    # Pick the biggest tm whose double-buffered footprint (plus the f32
    # matmul/activation temp) stays within budget.
    slab_tm = None
    slab_fp = 0
    for tm in (512, 256, 128):
        tm_eff = min(tm, n_sub)
        fp = (
            2 * tm_eff * d_lanes * in_b      # z0 tile, double-buffered
            + 2 * n_sub * d_lanes * in_b     # z1 panel (2 buffers)
            + 2 * tm_eff * n_lanes * out_b   # output slab, double-buffered
            + tm_eff * n_lanes * 4           # f32 dot/activation intermediate
        )
        if fp <= _SLAB_VMEM_BUDGET:
            slab_tm, slab_fp = tm_eff, fp
            break

    if slab_tm is not None:
        tm = slab_tm
        grid = (B, pl.cdiv(N, tm))
        grid_spec = pltpu.PrefetchScalarGridSpec(
            num_scalar_prefetch=0,
            grid=grid,
            in_specs=[
                pl.BlockSpec((None, tm, D), lambda b, i: (b, i, 0)),
                # Block index depends only on b -> z1 DMA'd once per batch.
                pl.BlockSpec((None, N, D), lambda b, i: (b, 0, 0)),
            ],
            out_specs=pl.BlockSpec((None, tm, N), lambda b, i: (b, i, 0)),
        )
        dims = ("parallel", "parallel")
        vmem_limit = int(slab_fp + 8 * 1024 * 1024)
    else:
        # ---- Regime B (very large N): 2-D tiled output, 1024 tiles. Accepts
        # the redundant z1 reads; boundary tiles (if N % tile != 0) get masked
        # stores instead of padding + a post-kernel slice copy.
        tm = min(1024, n_sub)
        tn = min(1024, n_lanes)
        grid = (B, pl.cdiv(N, tm), pl.cdiv(N, tn))
        fp = (
            2 * tm * d_lanes * in_b
            + 2 * tn * d_lanes * in_b
            + 2 * tm * tn * out_b
            + tm * tn * 4
        )
        grid_spec = pltpu.PrefetchScalarGridSpec(
            num_scalar_prefetch=0,
            grid=grid,
            in_specs=[
                pl.BlockSpec((None, tm, D), lambda b, i, j: (b, i, 0)),
                pl.BlockSpec((None, tn, D), lambda b, i, j: (b, j, 0)),
            ],
            out_specs=pl.BlockSpec((None, tm, tn), lambda b, i, j: (b, i, j)),
        )
        dims = ("parallel", "parallel", "parallel")
        vmem_limit = int(fp + 8 * 1024 * 1024)

    adj = pl.pallas_call(
        _inner_product_decoder_kernel,
        out_shape=jax.ShapeDtypeStruct((B, N, N), out_dtype),
        grid_spec=grid_spec,
        compiler_params=pltpu.CompilerParams(
            dimension_semantics=dims,
            vmem_limit_bytes=vmem_limit,
        ),
    )(z_0, z_1)

    # Metadata-only reshape in plain JAX: (B, N, N) -> (B, 1, N, N)
    return adj.reshape(B, 1, N, N)


if __name__ == "__main__":
    key = jax.random.PRNGKey(0)
    k0, k1, k2, k3 = jax.random.split(key, 4)

    # Case 1: lane-aligned N (typical small node-embedding shapes).
    B, N, D = 2, 128, 32
    z_0 = jax.random.normal(k0, (B, N, D), dtype=jnp.float32)
    z_1 = jax.random.normal(k1, (B, N, D), dtype=jnp.float32)
    adj = jax.block_until_ready(inner_product_decoder(z_0, z_1))
    ref = jax.nn.sigmoid(jnp.einsum("bnd,bmd->bnm", z_0, z_1)).reshape(B, 1, N, N)
    assert adj.shape == (B, 1, N, N)
    assert jnp.allclose(adj, ref, atol=1e-5, rtol=1e-5)

    # Case 2: N not a multiple of 128 (exercises masked boundary stores,
    # no padding / post-kernel slice).
    B2, N2, D2 = 2, 200, 32
    z_0b = jax.random.normal(k2, (B2, N2, D2), dtype=jnp.float32)
    z_1b = jax.random.normal(k3, (B2, N2, D2), dtype=jnp.float32)
    adj_b = jax.block_until_ready(inner_product_decoder(z_0b, z_1b))
    ref_b = jax.nn.sigmoid(jnp.einsum("bnd,bmd->bnm", z_0b, z_1b)).reshape(B2, 1, N2, N2)
    assert adj_b.shape == (B2, 1, N2, N2)
    assert jnp.allclose(adj_b, ref_b, atol=1e-5, rtol=1e-5)

    print("KERNEL_OK")
</pallas_src>

<mosaic_0001>
module attributes {stable_mosaic.version = 11 : i64} {
  func.func @_inner_product_decoder_kernel(%arg0: i32, %arg1: i32, %arg2: memref<1x128x32xf32, #tpu.memory_space<vmem>>, %arg3: memref<1x128x32xf32, #tpu.memory_space<vmem>>, %arg4: memref<1x128x128xf32, #tpu.memory_space<vmem>>) attributes {dimension_semantics = [#tpu.dimension_semantics<parallel>, #tpu.dimension_semantics<parallel>], iteration_bounds = array<i64: 2, 1>, scalar_prefetch = 0 : i64, scratch_operands = 0 : i64, tpu.core_type = #tpu.core_type<tc>, window_params = [{transform_indices = @transform_0, window_bounds = array<i64: 1, 128, 32>}, {transform_indices = @transform_1, window_bounds = array<i64: 1, 128, 32>}, {transform_indices = @transform_2, window_bounds = array<i64: 1, 128, 128>}]} {
    %c0 = arith.constant 0 : index
    %c0_0 = arith.constant 0 : index
    %c0_1 = arith.constant 0 : index
    %0 = vector.load %arg2[%c0, %c0_0, %c0_1] : memref<1x128x32xf32, #tpu.memory_space<vmem>>, vector<1x128x32xf32>
    %1 = vector.shape_cast %0 : vector<1x128x32xf32> to vector<128x32xf32>
    %c0_2 = arith.constant 0 : index
    %c0_3 = arith.constant 0 : index
    %c0_4 = arith.constant 0 : index
    %2 = vector.load %arg3[%c0_2, %c0_3, %c0_4] : memref<1x128x32xf32, #tpu.memory_space<vmem>>, vector<1x128x32xf32>
    %3 = vector.shape_cast %2 : vector<1x128x32xf32> to vector<128x32xf32>
    %cst = arith.constant dense<0.000000e+00> : vector<128x128xf32>
    %4 = tpu.matmul %1, %3, %cst {dimension_numbers = #tpu.dot_dimension_numbers<[1], [1], [0], [0], [0, 0, 1, 0], [], []>} : vector<128x32xf32>, vector<128x32xf32>, vector<128x128xf32> -> vector<128x128xf32>
    %cst_5 = arith.constant 5.000000e-01 : f32
    %5 = vector.broadcast %cst_5 : f32 to vector<128x128xf32>
    %6 = arith.mulf %5, %4 : vector<128x128xf32>
    %7 = math.tanh %6 : vector<128x128xf32>
    %cst_6 = arith.constant 5.000000e-01 : f32
    %8 = vector.broadcast %cst_6 : f32 to vector<128x128xf32>
    %9 = arith.mulf %8, %7 : vector<128x128xf32>
    %cst_7 = arith.constant 5.000000e-01 : f32
    %10 = vector.broadcast %cst_7 : f32 to vector<128x128xf32>
    %11 = arith.addf %9, %10 : vector<128x128xf32>
    %c0_8 = arith.constant 0 : index
    %c0_9 = arith.constant 0 : index
    %c0_10 = arith.constant 0 : index
    %12 = vector.load %arg4[%c0_8, %c0_9, %c0_10] : memref<1x128x128xf32, #tpu.memory_space<vmem>>, vector<1x128x128xf32>
    %13 = vector.shape_cast %12 : vector<1x128x128xf32> to vector<128x128xf32>
    %14 = vector.shape_cast %11 : vector<128x128xf32> to vector<1x128x128xf32>
    tpu.vector_store %arg4[%c0_8, %c0_9, %c0_10], %14 {strides = array<i32>} : memref<1x128x128xf32, #tpu.memory_space<vmem>>, vector<1x128x128xf32>,
    return
  }
  func.func @transform_0(%arg0: i32, %arg1: i32) -> (i32, i32, i32) {
    %c0_i32 = arith.constant 0 : i32
    %c0_i32_0 = arith.constant 0 : i32
    return %arg0, %arg1, %c0_i32 : i32, i32, i32
  }
  func.func @transform_1(%arg0: i32, %arg1: i32) -> (i32, i32, i32) {
    %c0_i32 = arith.constant 0 : i32
    %c0_i32_0 = arith.constant 0 : i32
    %c0_i32_1 = arith.constant 0 : i32
    return %arg0, %c0_i32, %c0_i32_0 : i32, i32, i32
  }
  func.func @transform_2(%arg0: i32, %arg1: i32) -> (i32, i32, i32) {
    %c0_i32 = arith.constant 0 : i32
    %c0_i32_0 = arith.constant 0 : i32
    return %arg0, %arg1, %c0_i32 : i32, i32, i32
  }
}

</mosaic_0001>

<bundles_post_ra>
// kernel: tpu_custom_call.1
= control target key start
LH: loop header
LB: loop body
LE: loop exit
PB: predicated region body
PF: predicated region fallthrough
CT: control target
= control target key end

     0   :  { %7 = vsyncpa [#allocation3], 0  ;;  %s1306_s0 = inlined_call_operand.vmem [shape: f32[2,128,32], index: 0, kind: input, shape index: {}]   ;;  %s1307_s1 = inlined_call_operand.vmem [shape: f32[2,128,32], index: 1, kind: input, shape index: {}]   ;;  %s1308_s2 = inlined_call_operand.hbm [shape: f32[2,128,128], index: 2, kind: output, shape index: {}]  }
   0x1   :  { %9 = vsyncpa [#allocation3 + $0x1], 0  ;;  %s1043_s9 = smov 0   ;;  %s1045_s10 = smov 0  }
   0x2   :  { %s1047_s11 = smov 0   ;;  %s1049_s12 = smov 0  }
   0x3   :  { %s1051_s13 = smov 0   ;;  %s1053_s14 = smov 0  }
   0x4 LB: > { %s654_s15 = sadd.s32 4294967295, %s1023_s14   ;;  %s655_s16 = sadd.s32 4294967294, %s1023_s14   ;;  %s1023_s14 = sphi %s1053_s14, %s15_s14   ;;  %s1019_s13 = sphi %s1051_s13, %s1317_s13   ;;  %s1015_s12 = sphi %s1049_s12, %s1316_s12   ;;  %s1011_s11 = sphi %s1047_s11, %s1315_s11   ;;  %s1007_s10 = sphi %s1045_s10, %s1314_s10   ;;  %s1003_s9 = sphi %s1043_s9, %s1313_s9  }
   0x5   : > { %s27_s17 = sadd.s32 1, %s1019_s13  ;;  %s90_s18 = sadd.s32 1, %s1011_s11 }
   0x6   : > { %p29_p0 = scmp.ge.s32.totalorder %s27_s17, 2  ;;  %p100_p1 = scmp.ne.s32.totalorder %s1011_s11, %s1007_s10 }
   0x7   : > { %p101_p2 = scmp.eq.s32.totalorder %s654_s15, 1  ;;  %p106_p3 = scmp.ne.s32.totalorder %s1007_s10, %s1003_s9 }
   0x8   : > { %s1319_s17 = smov (%p29_p0, %s27_s17), 0  ;;  %p107_p5 = scmp.eq.s32.totalorder %s655_s16, 1 }
   0x9   : > { %p1083_p4 = por %p101_p2, %p100_p1  ;;  %s85_s20 = ssub.s32 %s1019_s13, %s1319_s17 }
   0xa   : > { %p658_p6 = scmp.ge.s32.totalorder %s1023_s14, 1  ;;  %p88_p7 = scmp.eq.s32.totalorder %s85_s20, 0 }
   0xb   : > { %p1090_p8 = por %p107_p5, %p106_p3  ;;  %p146_p9 = scmp.lt.s32.totalorder %s1023_s14, 3 }
   0xc   : > { %s1096_s22 = scalar_select %p88_p7, %s1011_s11, %s90_s18  }
   0xd   : > { %p147_p10 = pnand %p658_p6, %p146_p9 }
   0xe   : > { %p178_p11 = scmp.lt.s32.totalorder (!%p147_p10), %s1015_s12, 1  ;;  %vm225_vm0 = vcmask (!%p147_p10), 261120   ;;  %s174_s3 = sand.u32 (!%p147_p10), 1, %s1007_s10  }
   0xf   : > { %150 = sbr.rel (%p147_p10) target bundleno = 352 (0x160), region = 28  ;;  %vm1107_vm1 = vmpackc.low (!%p147_p10), %vm225_vm0, %vm225_vm0  ;;  %s659_s4 = sshll.u32 (!%p147_p10), %s174_s3, 7 }
  0x10   : > { %s1231_s5 = scalar_lea.vmem (!%p147_p10), [#allocation2], %s659_s4  ;;  %s703_s6 = sshll.u32 (!%p147_p10), %s1015_s12, 11 }
  0x11   : > { %s563_s7 = sshll.u32 (!%p147_p10), %s1231_s5, 4  ;;  %s1251_s16 = scalar_lea.hbm (!%p147_p10), %s1308_s2, %s703_s6  ;;  %s1253_s7 = int_to_ptr.vmem [resolvable:$true] %s563_s7 }
  0x12   : > { %s945_s18 = scalar_lea.vmem (!%p147_p10), %s1253_s7, 2048  ;;  %s1025_s20 = smov (!%p147_p10), [#allocation2]  }
  0x13   : > { %p946_p12 = scmp.ne.s32.totalorder (!%p147_p10), %s1253_s7, %s945_s18 }
  0x15   : > { %p947_p13 = pnand (!%p147_p10), %p946_p12, %p1083_p4 }
  0x16   : > { %s179_s23 = scalar_select %p178_p11, %s1015_s12, 1 }
  0x17   : > { %s1260_s12 = scalar_lea.sflag [#allocation3], %s174_s3  ;;  %p948_p0 = pneg %p947_p13 }
  0x18   : > { %s701_s24 = sshll.u32 %s179_s23, 7  ;;  %s949_s23 = sshll.u32 %s1025_s20, 4  ;;  %s950_s23 = int_to_ptr.vmem [resolvable:$false] %s949_s23 }
  0x19   : > { %s1103_s27 = scalar_lea.vmem %s1307_s1, %s701_s24  ;;  %s1118_s30 = scalar_lea.vmem %s1306_s0, %s701_s24 }
  0x1a   : > { %v209_v1 = vld [vmem:[%s1103_s27] sm:$0xff]  ;;  %v210_v2 = vld [vmem:[%s1103_s27 + $0x8] sm:$0xff]  ;;  %v211_v3 = vld [vmem:[%s1103_s27 + $0x10] sm:$0xff]  ;;  %s951_s24 = scalar_lea.vmem %s950_s23, 4096  ;;  %p952_p1 = scmp.lt.s32.totalorder %s1253_s7, %s950_s23 }
  0x1b   : > { %v792_v4 = vpack.c.bf16 %v210_v2, %v209_v1  ;;  %v212_v5 = vld [vmem:[%s1103_s27 + $0x18] sm:$0xff]  ;;  %v193_v7 = vld [vmem:[%s1118_s30] sm:$0xff]  ;;  %v214_v10 = vld [vmem:[%s1103_s27 + $0x28] sm:$0xff]  ;;  %p953_p2 = scmp.lt.s32.totalorder %s951_s24, %s945_s18 }
  0x1c   : > { %v798_v6 = vpack.c.bf16 %v212_v5, %v211_v3  ;;  %v201_v8 = vld [vmem:[%s1118_s30 + $0x40] sm:$0xff]  ;;  %768 = vmatprep.mubr.msk.f32.mxu0 %vm225_vm0, %v193_v7  ;;  %v215_v12 = vld [vmem:[%s1103_s27 + $0x30] sm:$0xff]  ;;  %v216_v13 = vld [vmem:[%s1103_s27 + $0x38] sm:$0xff] }
  0x1d   : > { %794 = vmatprep.subr.msk.bf16.mxu0 %vm1107_vm1, %v792_v4  ;;  %840 = vmatprep.subr.msk.bf16.mxu1 %vm1107_vm1, %v792_v4  ;;  %v213_v9 = vld [vmem:[%s1103_s27 + $0x20] sm:$0xff]  ;;  %v810_v14 = vpack.c.bf16 %v216_v13, %v215_v12  ;;  %v218_v16 = vld [vmem:[%s1103_s27 + $0x48] sm:$0xff]  ;;  %v219_v18 = vld [vmem:[%s1103_s27 + $0x50] sm:$0xff]  ;;  %p954_p3 = por %p953_p2, %p952_p1 }
  0x1e   : > { %797 = vmatpush3.bf16.xpose.msk.msra.mxu0 %vm1107_vm1, %v792_v4  ;;  %848 = vmatpush3.bf16.xpose.msk.msra.mxu1 %vm1107_vm1, %v792_v4  ;;  %v804_v11 = vpack.c.bf16 %v214_v10, %v213_v9  ;;  %v217_v15 = vld [vmem:[%s1103_s27 + $0x40] sm:$0xff]  ;;  %v220_v19 = vld [vmem:[%s1103_s27 + $0x58] sm:$0xff]  ;;  %v222_v22 = vld [vmem:[%s1103_s27 + $0x68] sm:$0xff] }
  0x1f   : > { %800 = vmatprep.subr.msk.bf16.mxu0 %vm1107_vm1, %v798_v6  ;;  %841 = vmatprep.subr.msk.bf16.mxu1 %vm1107_vm1, %v798_v6  ;;  %v816_v17 = vpack.c.bf16 %v218_v16, %v217_v15  ;;  %v822_v20 = vpack.c.bf16 %v220_v19, %v219_v18  ;;  %v221_v21 = vld [vmem:[%s1103_s27 + $0x60] sm:$0xff]  ;;  %v223_v24 = vld [vmem:[%s1103_s27 + $0x70] sm:$0xff]  ;;  %v224_v25 = vld [vmem:[%s1103_s27 + $0x78] sm:$0xff]  ;;  %p955_p5 = pnand %p954_p3, %p948_p0 }
  0x20   : > { %780 = vmatprep.mubr.msk.f32.mxu1 %vm225_vm0, %v201_v8  ;;  %v828_v23 = vpack.c.bf16 %v222_v22, %v221_v21  ;;  %v834_v26 = vpack.c.bf16 %v224_v25, %v223_v24  ;;  %v194_v27 = vld [vmem:[%s1118_s30 + $0x8] sm:$0xff]  ;;  %v195_v29 = vld [vmem:[%s1118_s30 + $0x10] sm:$0xff]  ;;  %v196_v31 = vld [vmem:[%s1118_s30 + $0x18] sm:$0xff] }
  0x21   : > { %v202_v28 = vld [vmem:[%s1118_s30 + $0x48] sm:$0xff]  ;;  %v203_v30 = vld [vmem:[%s1118_s30 + $0x50] sm:$0xff]  ;;  %v204_v32 = vld [vmem:[%s1118_s30 + $0x58] sm:$0xff] }
  0x22   : > { %v197_v33 = vld [vmem:[%s1118_s30 + $0x20] sm:$0xff]  ;;  %v198_v35 = vld [vmem:[%s1118_s30 + $0x28] sm:$0xff]  ;;  %v199_v37 = vld [vmem:[%s1118_s30 + $0x30] sm:$0xff] }
  0x23   : > { %v205_v34 = vld [vmem:[%s1118_s30 + $0x60] sm:$0xff]  ;;  %v206_v36 = vld [vmem:[%s1118_s30 + $0x68] sm:$0xff]  ;;  %v207_v38 = vld [vmem:[%s1118_s30 + $0x70] sm:$0xff] }
  0x24   : > { %v200_v39 = vld [vmem:[%s1118_s30 + $0x38] sm:$0xff] }
  0x25   : > { %v208_v40 = vld [vmem:[%s1118_s30 + $0x78] sm:$0xff] }
  0x26   : > { %803 = vmatpush3.bf16.xpose.msk.msra.mxu0 %vm1107_vm1, %v798_v6  ;;  %849 = vmatpush3.bf16.xpose.msk.msra.mxu1 %vm1107_vm1, %v798_v6 }
  0x27   : > { %806 = vmatprep.subr.msk.bf16.mxu0 %vm1107_vm1, %v804_v11  ;;  %842 = vmatprep.subr.msk.bf16.mxu1 %vm1107_vm1, %v804_v11 }
  0x2e   : > { %809 = vmatpush3.bf16.xpose.msk.msra.mxu0 %vm1107_vm1, %v804_v11  ;;  %850 = vmatpush3.bf16.xpose.msk.msra.mxu1 %vm1107_vm1, %v804_v11 }
  0x2f   : > { %812 = vmatprep.subr.msk.bf16.mxu0 %vm1107_vm1, %v810_v14  ;;  %843 = vmatprep.subr.msk.bf16.mxu1 %vm1107_vm1, %v810_v14 }
  0x36   : > { %815 = vmatpush3.bf16.xpose.msk.msra.mxu0 %vm1107_vm1, %v810_v14  ;;  %851 = vmatpush3.bf16.xpose.msk.msra.mxu1 %vm1107_vm1, %v810_v14 }
  0x37   : > { %818 = vmatprep.subr.msk.bf16.mxu0 %vm1107_vm1, %v816_v17  ;;  %844 = vmatprep.subr.msk.bf16.mxu1 %vm1107_vm1, %v816_v17 }
  0x3e   : > { %821 = vmatpush3.bf16.xpose.msk.msra.mxu0 %vm1107_vm1, %v816_v17  ;;  %852 = vmatpush3.bf16.xpose.msk.msra.mxu1 %vm1107_vm1, %v816_v17 }
  0x3f   : > { %824 = vmatprep.subr.msk.bf16.mxu0 %vm1107_vm1, %v822_v20  ;;  %845 = vmatprep.subr.msk.bf16.mxu1 %vm1107_vm1, %v822_v20 }
  0x46   : > { %827 = vmatpush3.bf16.xpose.msk.msra.mxu0 %vm1107_vm1, %v822_v20  ;;  %853 = vmatpush3.bf16.xpose.msk.msra.mxu1 %vm1107_vm1, %v822_v20 }
  0x47   : > { %830 = vmatprep.subr.msk.bf16.mxu0 %vm1107_vm1, %v828_v23  ;;  %846 = vmatprep.subr.msk.bf16.mxu1 %vm1107_vm1, %v828_v23 }
  0x4e   : > { %833 = vmatpush3.bf16.xpose.msk.msra.mxu0 %vm1107_vm1, %v828_v23  ;;  %854 = vmatpush3.bf16.xpose.msk.msra.mxu1 %vm1107_vm1, %v828_v23 }
  0x4f   : > { %836 = vmatprep.subr.msk.bf16.mxu0 %vm1107_vm1, %v834_v26  ;;  %847 = vmatprep.subr.msk.bf16.mxu1 %vm1107_vm1, %v834_v26 }
  0x56   : > { %839 = vmatpush3.bf16.xpose.msk.msra.mxu0 %vm1107_vm1, %v834_v26  ;;  %855 = vmatpush3.bf16.xpose.msk.msra.mxu1 %vm1107_vm1, %v834_v26 }
  0x5d   : > { %769 = vmatmul.mubr.msk.f32.vlgmr.msra.gmra.mrb[0].mxu0 %vm225_vm0, %v194_v27  ;;  %781 = vmatmul.mubr.msk.f32.vlgmr.msra.gmra.mrb[0].mxu1 %vm225_vm0, %v202_v28 }
  0x5e   : > { %771 = vmatprep.mubr.msk.f32.mxu0 %vm225_vm0, %v195_v29  ;;  %783 = vmatprep.mubr.msk.f32.mxu1 %vm225_vm0, %v203_v30 }
  0x61   : > { %772 = vmatmul.mubr.msk.f32.gmra.mrb[2].mxu0 %vm225_vm0, %v196_v31  ;;  %784 = vmatmul.mubr.msk.f32.gmra.mrb[2].mxu1 %vm225_vm0, %v204_v32 }
  0x62   : > { %774 = vmatprep.mubr.msk.f32.mxu0 %vm225_vm0, %v197_v33  ;;  %786 = vmatprep.mubr.msk.f32.mxu1 %vm225_vm0, %v205_v34 }
  0x65   : > { %775 = vmatmul.mubr.msk.f32.gmra.mrb[4].mxu0 %vm225_vm0, %v198_v35  ;;  %787 = vmatmul.mubr.msk.f32.gmra.mrb[4].mxu1 %vm225_vm0, %v206_v36 }
  0x66   : > { %777 = vmatprep.mubr.msk.f32.mxu0 %vm225_vm0, %v199_v37  ;;  %789 = vmatprep.mubr.msk.f32.mxu1 %vm225_vm0, %v207_v38 }
  0x69   : > { %778 = vmatmul.mubr.msk.f32.gmra.mrb[6].mxu0 %vm225_vm0, %v200_v39  ;;  %790 = vmatmul.mubr.msk.f32.gmra.mrb[6].mxu1 %vm225_vm0, %v208_v40 }
 0x130   : > { %v770_v41 = vpop.f32.mrb[0].mxu0  ;;  %v782_v42 = vpop.f32.mrb[0].mxu1 }
 0x131   : > { %v468_v43 = vmul.f32 0.5, %v770_v41  ;;  %v476_v44 = vmul.f32 0.5, %v782_v42  ;;  %v388_v45 = vpop.f32.mrb[1].mxu0  ;;  %v428_v46 = vpop.f32.mrb[1].mxu1 }
 0x132   : > { %v467_v47 = vmul.f32 0.5, %v388_v45  ;;  %v475_v48 = vmul.f32 0.5, %v428_v46 }
 0x133   : > { %913 = vtanh.f32 %v468_v43 }
 0x134   : > { %915 = vtanh.f32 %v476_v44  ;;  %v773_v49 = vpop.f32.mrb[2].mxu0  ;;  %v785_v50 = vpop.f32.mrb[2].mxu1 }
 0x135   : > { %917 = vtanh.f32 %v467_v47  ;;  %v470_v51 = vmul.f32 0.5, %v773_v49  ;;  %v478_v52 = vmul.f32 0.5, %v785_v50  ;;  %v398_v53 = vpop.f32.mrb[3].mxu0  ;;  %v438_v54 = vpop.f32.mrb[3].mxu1 }
 0x136   : > { %919 = vtanh.f32 %v475_v48  ;;  %v469_v55 = vmul.f32 0.5, %v398_v53  ;;  %v477_v56 = vmul.f32 0.5, %v438_v54 }
 0x137   : > { %921 = vtanh.f32 %v470_v51 }
 0x138   : > { %923 = vtanh.f32 %v478_v52  ;;  %v776_v57 = vpop.f32.mrb[4].mxu0  ;;  %v788_v58 = vpop.f32.mrb[4].mxu1 }
 0x139   : > { %925 = vtanh.f32 %v469_v55  ;;  %v472_v59 = vmul.f32 0.5, %v776_v57  ;;  %v480_v60 = vmul.f32 0.5, %v788_v58  ;;  %v408_v61 = vpop.f32.mrb[5].mxu0  ;;  %v448_v62 = vpop.f32.mrb[5].mxu1 }
 0x13a   : > { %927 = vtanh.f32 %v477_v56  ;;  %v471_v63 = vmul.f32 0.5, %v408_v61  ;;  %v479_v0 = vmul.f32 0.5, %v448_v62 }
 0x13b   : > { %929 = vtanh.f32 %v472_v59 }
 0x13c   : > { %931 = vtanh.f32 %v480_v60  ;;  %v779_v1 = vpop.f32.mrb[6].mxu0  ;;  %v791_v2 = vpop.f32.mrb[6].mxu1 }
 0x13d   : > { %v914_v3 = vpop.eup %913  ;;  %933 = vtanh.f32 %v471_v63  ;;  %v474_v4 = vmul.f32 0.5, %v779_v1  ;;  %v482_v5 = vmul.f32 0.5, %v791_v2  ;;  %v418_v6 = vpop.f32.mrb[7].mxu0 }
 0x13e   : > { %v458_v7 = vpop.f32.mrb[7].mxu1  ;;  %v916_v8 = vpop.eup %915  ;;  %v500_v9 = vmul.f32 0.5, %v914_v3  ;;  %935 = vtanh.f32 %v479_v0  ;;  %v473_v10 = vmul.f32 0.5, %v418_v6 }
 0x13f   : > { %v481_v11 = vmul.f32 0.5, %v458_v7  ;;  %v918_v12 = vpop.eup %917  ;;  %v508_v13 = vmul.f32 0.5, %v916_v8  ;;  %937 = vtanh.f32 %v474_v4 }
 0x140   : > { %v920_v14 = vpop.eup %919  ;;  %v516_v15 = vadd.f32 0.5, %v500_v9  ;;  %v499_v16 = vmul.f32 0.5, %v918_v12  ;;  %939 = vtanh.f32 %v482_v5 }
 0x141   : > { %v922_v17 = vpop.eup %921  ;;  %v524_v18 = vadd.f32 0.5, %v508_v13  ;;  %v507_v19 = vmul.f32 0.5, %v920_v14  ;;  %941 = vtanh.f32 %v473_v10 }
 0x142   : > { %v924_v20 = vpop.eup %923  ;;  %532 = vst [vmem:[%s1231_s5 + $0x8] sm:$0xff] %v516_v15  ;;  %v515_v21 = vadd.f32 0.5, %v499_v16  ;;  %v502_v22 = vmul.f32 0.5, %v922_v17  ;;  %943 = vtanh.f32 %v481_v11 }
 0x143   : > { %v926_v23 = vpop.eup %925  ;;  %540 = vst [vmem:[%s1231_s5 + $0x48] sm:$0xff] %v524_v18  ;;  %v523_v24 = vadd.f32 0.5, %v507_v19  ;;  %v510_v25 = vmul.f32 0.5, %v924_v20 }
 0x144   : > { %v928_v26 = vpop.eup %927  ;;  %531 = vst [vmem:[%s1231_s5] sm:$0xff] %v515_v21  ;;  %v518_v27 = vadd.f32 0.5, %v502_v22  ;;  %v501_v28 = vmul.f32 0.5, %v926_v23 }
 0x145   : > { %v930_v29 = vpop.eup %929  ;;  %539 = vst [vmem:[%s1231_s5 + $0x40] sm:$0xff] %v523_v24  ;;  %v526_v30 = vadd.f32 0.5, %v510_v25  ;;  %v509_v31 = vmul.f32 0.5, %v928_v26 }
 0x146   : > { %v932_v32 = vpop.eup %931  ;;  %534 = vst [vmem:[%s1231_s5 + $0x18] sm:$0xff] %v518_v27  ;;  %v517_v33 = vadd.f32 0.5, %v501_v28  ;;  %v504_v34 = vmul.f32 0.5, %v930_v29 }
 0x147   : > { %v934_v35 = vpop.eup %933  ;;  %542 = vst [vmem:[%s1231_s5 + $0x58] sm:$0xff] %v526_v30  ;;  %v525_v36 = vadd.f32 0.5, %v509_v31  ;;  %v512_v37 = vmul.f32 0.5, %v932_v32 }
 0x148   : > { %v936_v38 = vpop.eup %935  ;;  %533 = vst [vmem:[%s1231_s5 + $0x10] sm:$0xff] %v517_v33  ;;  %v520_v39 = vadd.f32 0.5, %v504_v34  ;;  %v503_v40 = vmul.f32 0.5, %v934_v35 }
 0x149   : > { %v938_v41 = vpop.eup %937  ;;  %541 = vst [vmem:[%s1231_s5 + $0x50] sm:$0xff] %v525_v36  ;;  %v528_v42 = vadd.f32 0.5, %v512_v37  ;;  %v511_v43 = vmul.f32 0.5, %v936_v38 }
 0x14a   : > { %v940_v44 = vpop.eup %939  ;;  %536 = vst [vmem:[%s1231_s5 + $0x28] sm:$0xff] %v520_v39  ;;  %v519_v45 = vadd.f32 0.5, %v503_v40  ;;  %v506_v46 = vmul.f32 0.5, %v938_v41 }
 0x14b   : > { %v942_v47 = vpop.eup %941  ;;  %544 = vst [vmem:[%s1231_s5 + $0x68] sm:$0xff] %v528_v42  ;;  %v527_v48 = vadd.f32 0.5, %v511_v43  ;;  %v514_v49 = vmul.f32 0.5, %v940_v44 }
 0x14c   : > { %v944_v50 = vpop.eup %943  ;;  %535 = vst [vmem:[%s1231_s5 + $0x20] sm:$0xff] %v519_v45  ;;  %v522_v51 = vadd.f32 0.5, %v506_v46  ;;  %v505_v52 = vmul.f32 0.5, %v942_v47 }
 0x14d   : > { %543 = vst [vmem:[%s1231_s5 + $0x60] sm:$0xff] %v527_v48  ;;  %v530_v53 = vadd.f32 0.5, %v514_v49  ;;  %v513_v54 = vmul.f32 0.5, %v944_v50 }
 0x14e   : > { %538 = vst [vmem:[%s1231_s5 + $0x38] sm:$0xff] %v522_v51  ;;  %v521_v55 = vadd.f32 0.5, %v505_v52 }
 0x14f   : > { %546 = vst [vmem:[%s1231_s5 + $0x78] sm:$0xff] %v530_v53  ;;  %v529_v56 = vadd.f32 0.5, %v513_v54 }
 0x150   : > { %537 = vst [vmem:[%s1231_s5 + $0x30] sm:$0xff] %v521_v55 }
 0x151   : > { %545 = vst [vmem:[%s1231_s5 + $0x70] sm:$0xff] %v529_v56 }
 0x152   : > { %958 = shalt.err (!%p955_p5)
}
 0x153   : > { %s959_s25 = scalar_lea.hbm %s1251_s16, 2048  ;;  %s963_s28 = scalar_lea.hbm %s1308_s2, 4096 }
 0x154   : > { %p960_p6 = scmp.ne.s32.totalorder %s1251_s16, %s959_s25  ;;  %p964_p10 = scmp.lt.u32.totalorder %s1251_s16, %s1308_s2 }
 0x155   : > { %p965_p11 = scmp.lt.u32.totalorder %s963_s28, %s959_s25  ;;  %p967_p13 = scmp.lt.u32.totalorder %s959_s25, %s1251_s16 }
 0x156   : > { %p961_p7 = pnand %p960_p6, %p1083_p4 }
 0x157   : > { %p966_p12 = por %p965_p11, %p964_p10 }
 0x158   : > { %p962_p9 = pneg %p961_p7 }
 0x159   : > { %p968_p0 = por %p967_p13, %p966_p12 }
 0x15b   : > { %p969_p1 = pnand %p968_p0, %p962_p9 }
 0x15d   : > { %972 = shalt.err (!%p969_p1)
}
 0x15e   : > { %s1026_s3 = smov 128   ;;  %s1027_s4 = smov 8  }
 0x15f   : > { %856 = dma.vmem_to_hbm [thread:$0]  (%p1083_p4), %s1253_s7, 2048, %s1251_s16, %s1260_s12, %s1026_s3, %s1026_s3, %s1027_s4  }
 0x160 PF: > { %p862_p2 = scmp.ge.s32.totalorder %s1023_s14, 2  ;;  %s578_s5 = sand.u32 1, %s1003_s9  }
 0x161   : > { %s579_s6 = scalar_lea.sflag [#allocation3], %s578_s5 }
 0x162   : > { %p859_p3 = pnand %p862_p2, %p1090_p8 }
 0x164   : > { %998 = dma.done.wait (!%p859_p3), %s579_s6, 2048  }
 0x165   : > { %1000 = vsyncadd (!%p859_p3), %s579_s6, 4294965248  ;;  %s15_s14 = sadd.s32 1, %s1023_s14   ;;  %s1313_s9 = smov %s1007_s10 }
 0x166   : > { %p12_p5 = scmp.ge.s32.totalorder %s15_s14, 4   ;;  %s1314_s10 = smov %s1011_s11 }
 0x167   : > { %s1315_s11 = smov %s1096_s22  ;;  %s1316_s12 = smov %s1019_s13 }
 0x168   : > { %s1317_s13 = smov %s1319_s17  ;;  %14 = sbr.rel (!%p12_p5) target bundleno = 4 (0x4), region = 66 }
 0x16f   :  { %584 = vsyncpa [#allocation3], 1 }
 0x170   :  { %586 = vsyncpa [#allocation3 + $0x1], 1 }

</bundles_post_ra>
